<compile_context>
chip_gen: v7x
topology: tpu7x:2x2x1
jax: 0.10.0
libtpu: 0.0.40
codegen_flags: <defaults>
</compile_context>

<pallas_src>
import functools

import jax
import jax.numpy as jnp
from jax.experimental import pallas as pl
from jax.experimental.pallas import tpu as pltpu

H_DIM = 128


def _round_up(x, m):
    return (x + m - 1) // m * m


def _bf16_activations_ok():
    """bf16 elementwise only where the VALU is bf16-native (v6e / v7x)."""
    try:
        kind = jax.devices()[0].device_kind.lower()
    except Exception:
        return False
    return any(tag in kind for tag in ("v6", "v7", "7x"))


def _critic_kernel(use_bf16_act,
                   s_ref, a_ref,                 # [TM, o_dim] f32, [TM, a_dim] f32
                   w1_ref, b1_ref,               # [o_dim, 2h] bf16, [1, 2h] f32
                   w2s_ref, w2a_ref, b2_ref,     # [2h, 2h] bf16, [a_dim, 2h] bf16, [1, 2h] f32
                   w3_ref, b3_ref,               # [2h, h] bf16, [1, h] f32
                   w4_ref, b4_ref,               # [1, h] f32 (VMEM), [1, 1] f32 (SMEM)
                   out_ref):                     # [TM, 1] f32
    act = jnp.bfloat16 if use_bf16_act else jnp.float32

    s = s_ref[...].astype(jnp.bfloat16)
    a = a_ref[...].astype(jnp.bfloat16)

    # fcs1 + leaky_relu: bf16 MXU operands, f32 accumulate, elementwise in `act`.
    xs = jnp.dot(s, w1_ref[...], preferred_element_type=jnp.float32)
    xs = xs.astype(act) + b1_ref[...].astype(act)
    xs = jnp.maximum(xs, 0.01 * xs)

    # fc2 on concat([xs, action]) == xs @ W2s + action @ W2a  (concat folded away).
    x = (jnp.dot(xs.astype(jnp.bfloat16), w2s_ref[...],
                 preferred_element_type=jnp.float32)
         + jnp.dot(a, w2a_ref[...], preferred_element_type=jnp.float32))
    x = x.astype(act) + b2_ref[...].astype(act)
    x = jnp.maximum(x, 0.0)

    # fc3 + relu.
    x = jnp.dot(x.astype(jnp.bfloat16), w3_ref[...],
                preferred_element_type=jnp.float32)
    x = x.astype(act) + b3_ref[...].astype(act)
    x = jnp.maximum(x, 0.0)

    # fc4 head (N=1): broadcast-mul (VPU) + lane reduce (XLU) in f32.
    q = jnp.sum(x.astype(jnp.float32) * w4_ref[...], axis=-1, keepdims=True) + b4_ref[0, 0]
    out_ref[...] = q.astype(out_ref.dtype)
    # TODO(synk): if xprof shows vst.msk overhead on the [TM,1] output, emit q
    # lane-dense as (grid, TM) and reshape in the wrapper (tiny volume, low priority).


def prepare_params(params):
    """One-time prep: cast weights to bf16, lay the head weight out as a lane row.

    Do this OUTSIDE the per-step call so the f32->bf16 weight pass over HBM
    happens once, not on every inference step."""
    w1, b1, w2s, w2a, b2, w3, b3, w4, b4 = params
    h = w3.shape[1]
    return (w1.astype(jnp.bfloat16),
            b1.astype(jnp.float32),
            w2s.astype(jnp.bfloat16),
            w2a.astype(jnp.bfloat16),
            b2.astype(jnp.float32),
            w3.astype(jnp.bfloat16),
            b3.astype(jnp.float32),
            # (h, 1) -> (1, h): valid only because the head has a single output.
            w4.reshape(1, h).astype(jnp.float32),
            b4.reshape(1, 1).astype(jnp.float32))


def critic_forward(state, action, kparams, *, tm=1024):
    """state: [B, o_dim] f32, action: [B, a_dim] f32 -> [B, 1] f32.

    kparams must come from prepare_params()."""
    B, o_dim = state.shape
    a_dim = action.shape[1]
    w1b, b1, w2sb, w2ab, b2, w3b, b3, w4v, b4s = kparams
    h2 = w1b.shape[1]
    h = w3b.shape[1]

    # Batch tile: multiple of 8 sublanes, capped at `tm` (<=1024 keeps intermediates
    # inside v5e's 16 MiB scoped-VMEM default). Keep >= 2 grid steps when possible so
    # the "parallel" batch axis can shard across v7x's two TensorCores.
    TM = min(tm, _round_up(B, 8))
    if TM >= B and B > 8:
        TM = min(TM, _round_up((B + 1) // 2, 8))
    Bp = _round_up(B, TM)
    if Bp != B:
        pad = ((0, Bp - B), (0, 0))
        state = jnp.pad(state, pad)
        action = jnp.pad(action, pad)
    grid = (Bp // TM,)

    resident = lambda i: (0, 0)   # weights/biases: same block every step -> stay in VMEM

    flops = 2 * Bp * (o_dim * h2 + h2 * h2 + a_dim * h2 + h2 * h + h)
    bytes_accessed = (Bp * (o_dim + a_dim) * 4
                      + (w1b.size + w2sb.size + w2ab.size + w3b.size) * 2
                      + (b1.size + b2.size + b3.size + h + 1) * 4
                      + Bp * 4)

    out = pl.pallas_call(
        functools.partial(_critic_kernel, _bf16_activations_ok()),
        out_shape=jax.ShapeDtypeStruct((Bp, 1), jnp.float32),
        grid=grid,
        in_specs=[
            pl.BlockSpec((TM, o_dim), lambda i: (i, 0)),        # state tile
            pl.BlockSpec((TM, a_dim), lambda i: (i, 0)),        # action tile
            pl.BlockSpec((o_dim, h2), resident),                # W1
            pl.BlockSpec((1, h2), resident),                    # b1
            pl.BlockSpec((h2, h2), resident),                   # W2 (xs part)
            pl.BlockSpec((a_dim, h2), resident),                # W2 (action part)
            pl.BlockSpec((1, h2), resident),                    # b2
            pl.BlockSpec((h2, h), resident),                    # W3
            pl.BlockSpec((1, h), resident),                     # b3
            pl.BlockSpec((1, h), resident),                     # W4 as a lane row
            pl.BlockSpec(memory_space=pltpu.MemorySpace.SMEM),  # b4 scalar
        ],
        out_specs=pl.BlockSpec((TM, 1), lambda i: (i, 0)),
        compiler_params=pltpu.CompilerParams(
            dimension_semantics=("parallel",)),
        cost_estimate=pl.CostEstimate(
            flops=flops, transcendentals=0, bytes_accessed=bytes_accessed),
    )(state, action, w1b, b1, w2sb, w2ab, b2, w3b, b3, w4v, b4s)

    return out[:B]


def init_params(key, o_dim, a_dim, h_dim=H_DIM):
    """Deterministic init mirroring Critic.__init__ / reset_parameters.

    NOTE: hidden_init in the PyTorch code uses weight.size()[0] == out_features as the
    fan-in limit; that quirk is reproduced intentionally — do not "fix" it. Biases keep
    the PyTorch Linear default range U(-1/sqrt(in_features), 1/sqrt(in_features)).
    Weights are stored [in, out]."""
    h2 = h_dim * 2
    ks = jax.random.split(key, 8)

    def u(k, shape, lim):
        return jax.random.uniform(k, shape, jnp.float32, -lim, lim)

    # fcs1: o_dim -> 2h
    w1 = u(ks[0], (o_dim, h2), 1.0 / jnp.sqrt(h2))
    b1 = u(ks[1], (1, h2), 1.0 / jnp.sqrt(o_dim))
    # fc2: (2h + a_dim) -> 2h, split into xs-part and action-part
    lim2 = 1.0 / jnp.sqrt(h2)
    w2_full = u(ks[2], (h2 + a_dim, h2), lim2)
    w2s, w2a = w2_full[:h2, :], w2_full[h2:, :]
    b2 = u(ks[3], (1, h2), 1.0 / jnp.sqrt(h2 + a_dim))
    # fc3: 2h -> h
    w3 = u(ks[4], (h2, h_dim), 1.0 / jnp.sqrt(h_dim))
    b3 = u(ks[5], (1, h_dim), 1.0 / jnp.sqrt(h2))
    # fc4: h -> 1, weight U(-3e-3, 3e-3)
    w4 = u(ks[6], (h_dim, 1), 0.003)
    b4 = u(ks[7], (1, 1), 1.0 / jnp.sqrt(h_dim))

    return (w1, b1, w2s, w2a, b2, w3, b3, w4, b4)


if __name__ == "__main__":
    key = jax.random.PRNGKey(0)
    k_param, k_state, k_action = jax.random.split(key, 3)

    # Small demo shapes; B=50 -> TM=32, padded to 64, grid of 2 steps (exercises
    # padding and the multi-step / megacore path).
    B, O_DIM, A_DIM = 50, 32, 8
    params = init_params(k_param, O_DIM, A_DIM)
    kparams = prepare_params(params)          # one-time bf16 weight prep
    state = jax.random.normal(k_state, (B, O_DIM), jnp.float32)
    action = jax.random.normal(k_action, (B, A_DIM), jnp.float32)

    q = critic_forward(state, action, kparams)
    q = jax.block_until_ready(q)

    # sanity check against a pure-JAX f32 reference (bf16 weights/activations -> looser tol)
    w1, b1, w2s, w2a, b2, w3, b3, w4, b4 = params
    xs = state @ w1 + b1
    xs = jnp.where(xs > 0, xs, 0.01 * xs)
    x = jnp.maximum(xs @ w2s + action @ w2a + b2, 0.0)
    x = jnp.maximum(x @ w3 + b3, 0.0)
    q_ref = x @ w4 + b4

    assert q.shape == (B, 1)
    assert jnp.allclose(q, q_ref, atol=2e-2, rtol=2e-2), float(jnp.max(jnp.abs(q - q_ref)))

    print("KERNEL_OK")
</pallas_src>

<mosaic_0001>
module attributes {stable_mosaic.version = 11 : i64} {
  func.func @_critic_kernel(%arg0: i32, %arg1: memref<32x32xf32, #tpu.memory_space<vmem>>, %arg2: memref<32x8xf32, #tpu.memory_space<vmem>>, %arg3: memref<32x256xbf16, #tpu.memory_space<vmem>>, %arg4: memref<1x256xf32, #tpu.memory_space<vmem>>, %arg5: memref<256x256xbf16, #tpu.memory_space<vmem>>, %arg6: memref<8x256xbf16, #tpu.memory_space<vmem>>, %arg7: memref<1x256xf32, #tpu.memory_space<vmem>>, %arg8: memref<256x128xbf16, #tpu.memory_space<vmem>>, %arg9: memref<1x128xf32, #tpu.memory_space<vmem>>, %arg10: memref<1x128xf32, #tpu.memory_space<vmem>>, %arg11: memref<1x1xf32, #tpu.memory_space<smem>>, %arg12: memref<32x1xf32, #tpu.memory_space<vmem>>) attributes {dimension_semantics = [#tpu.dimension_semantics<parallel>], iteration_bounds = array<i64: 2>, scalar_prefetch = 0 : i64, scratch_operands = 0 : i64, tpu.core_type = #tpu.core_type<tc>, window_params = [{transform_indices = @transform_0, window_bounds = array<i64: 32, 32>}, {transform_indices = @transform_1, window_bounds = array<i64: 32, 8>}, {pipeline_mode = #tpu.pipeline_mode<synchronous>, transform_indices = @transform_2, window_bounds = array<i64: 32, 256>}, {pipeline_mode = #tpu.pipeline_mode<synchronous>, transform_indices = @transform_3, window_bounds = array<i64: 1, 256>}, {pipeline_mode = #tpu.pipeline_mode<synchronous>, transform_indices = @transform_4, window_bounds = array<i64: 256, 256>}, {pipeline_mode = #tpu.pipeline_mode<synchronous>, transform_indices = @transform_5, window_bounds = array<i64: 8, 256>}, {pipeline_mode = #tpu.pipeline_mode<synchronous>, transform_indices = @transform_6, window_bounds = array<i64: 1, 256>}, {pipeline_mode = #tpu.pipeline_mode<synchronous>, transform_indices = @transform_7, window_bounds = array<i64: 256, 128>}, {pipeline_mode = #tpu.pipeline_mode<synchronous>, transform_indices = @transform_8, window_bounds = array<i64: 1, 128>}, {pipeline_mode = #tpu.pipeline_mode<synchronous>, transform_indices = @transform_9, window_bounds = array<i64: 1, 128>}, {transform_indices = @transform_10, window_bounds = array<i64: 1, 1>}, {transform_indices = @transform_11, window_bounds = array<i64: 32, 1>}]} {
    %c0 = arith.constant 0 : index
    %c0_0 = arith.constant 0 : index
    %0 = vector.load %arg1[%c0, %c0_0] : memref<32x32xf32, #tpu.memory_space<vmem>>, vector<32x32xf32>
    %1 = arith.truncf %0 : vector<32x32xf32> to vector<32x32xbf16>
    %c0_1 = arith.constant 0 : index
    %c0_2 = arith.constant 0 : index
    %2 = vector.load %arg2[%c0_1, %c0_2] : memref<32x8xf32, #tpu.memory_space<vmem>>, vector<32x8xf32>
    %3 = arith.truncf %2 : vector<32x8xf32> to vector<32x8xbf16>
    %c0_3 = arith.constant 0 : index
    %c0_4 = arith.constant 0 : index
    %4 = vector.load %arg3[%c0_3, %c0_4] : memref<32x256xbf16, #tpu.memory_space<vmem>>, vector<32x256xbf16>
    %cst = arith.constant dense<0.000000e+00> : vector<32x256xf32>
    %5 = tpu.matmul %1, %4, %cst {dimension_numbers = #tpu.dot_dimension_numbers<[1], [0], [0], [1], [0, 0, 1, 1], [], []>} : vector<32x32xbf16>, vector<32x256xbf16>, vector<32x256xf32> -> vector<32x256xf32>
    %c0_5 = arith.constant 0 : index
    %c0_6 = arith.constant 0 : index
    %6 = vector.load %arg4[%c0_5, %c0_6] : memref<1x256xf32, #tpu.memory_space<vmem>>, vector<1x256xf32>
    %7 = vector.broadcast %6 : vector<1x256xf32> to vector<32x256xf32>
    %8 = arith.addf %5, %7 : vector<32x256xf32>
    %cst_7 = arith.constant 0.00999999977 : f32
    %9 = vector.broadcast %cst_7 : f32 to vector<32x256xf32>
    %10 = arith.mulf %9, %8 : vector<32x256xf32>
    %11 = arith.maximumf %8, %10 : vector<32x256xf32>
    %12 = arith.truncf %11 : vector<32x256xf32> to vector<32x256xbf16>
    %c0_8 = arith.constant 0 : index
    %c0_9 = arith.constant 0 : index
    %13 = vector.load %arg5[%c0_8, %c0_9] : memref<256x256xbf16, #tpu.memory_space<vmem>>, vector<256x256xbf16>
    %cst_10 = arith.constant dense<0.000000e+00> : vector<32x256xf32>
    %14 = tpu.matmul %12, %13, %cst_10 {dimension_numbers = #tpu.dot_dimension_numbers<[1], [0], [0], [1], [0, 0, 1, 1], [], []>} : vector<32x256xbf16>, vector<256x256xbf16>, vector<32x256xf32> -> vector<32x256xf32>
    %c0_11 = arith.constant 0 : index
    %c0_12 = arith.constant 0 : index
    %15 = vector.load %arg6[%c0_11, %c0_12] : memref<8x256xbf16, #tpu.memory_space<vmem>>, vector<8x256xbf16>
    %cst_13 = arith.constant dense<0.000000e+00> : vector<32x256xf32>
    %16 = tpu.matmul %3, %15, %cst_13 {dimension_numbers = #tpu.dot_dimension_numbers<[1], [0], [0], [1], [0, 0, 1, 1], [], []>} : vector<32x8xbf16>, vector<8x256xbf16>, vector<32x256xf32> -> vector<32x256xf32>
    %17 = arith.addf %14, %16 : vector<32x256xf32>
    %c0_14 = arith.constant 0 : index
    %c0_15 = arith.constant 0 : index
    %18 = vector.load %arg7[%c0_14, %c0_15] : memref<1x256xf32, #tpu.memory_space<vmem>>, vector<1x256xf32>
    %19 = vector.broadcast %18 : vector<1x256xf32> to vector<32x256xf32>
    %20 = arith.addf %17, %19 : vector<32x256xf32>
    %cst_16 = arith.constant 0.000000e+00 : f32
    %21 = vector.broadcast %cst_16 : f32 to vector<32x256xf32>
    %22 = arith.maximumf %20, %21 : vector<32x256xf32>
    %23 = arith.truncf %22 : vector<32x256xf32> to vector<32x256xbf16>
    %c0_17 = arith.constant 0 : index
    %c0_18 = arith.constant 0 : index
    %24 = vector.load %arg8[%c0_17, %c0_18] : memref<256x128xbf16, #tpu.memory_space<vmem>>, vector<256x128xbf16>
    %cst_19 = arith.constant dense<0.000000e+00> : vector<32x128xf32>
    %25 = tpu.matmul %23, %24, %cst_19 {dimension_numbers = #tpu.dot_dimension_numbers<[1], [0], [0], [1], [0, 0, 1, 1], [], []>} : vector<32x256xbf16>, vector<256x128xbf16>, vector<32x128xf32> -> vector<32x128xf32>
    %c0_20 = arith.constant 0 : index
    %c0_21 = arith.constant 0 : index
    %26 = vector.load %arg9[%c0_20, %c0_21] : memref<1x128xf32, #tpu.memory_space<vmem>>, vector<1x128xf32>
    %27 = vector.broadcast %26 : vector<1x128xf32> to vector<32x128xf32>
    %28 = arith.addf %25, %27 : vector<32x128xf32>
    %cst_22 = arith.constant 0.000000e+00 : f32
    %29 = vector.broadcast %cst_22 : f32 to vector<32x128xf32>
    %30 = arith.maximumf %28, %29 : vector<32x128xf32>
    %c0_23 = arith.constant 0 : index
    %c0_24 = arith.constant 0 : index
    %31 = vector.load %arg10[%c0_23, %c0_24] : memref<1x128xf32, #tpu.memory_space<vmem>>, vector<1x128xf32>
    %32 = vector.broadcast %31 : vector<1x128xf32> to vector<32x128xf32>
    %33 = arith.mulf %30, %32 : vector<32x128xf32>
    %cst_25 = arith.constant dense<0.000000e+00> : vector<32xf32>
    %34 = vector.multi_reduction <add>, %33, %cst_25 [1] : vector<32x128xf32> to vector<32xf32>
    %35 = vector.shape_cast %34 : vector<32xf32> to vector<32x1xf32>
    %c0_26 = arith.constant 0 : index
    %c0_27 = arith.constant 0 : index
    %36 = memref.load %arg11[%c0_26, %c0_27] : memref<1x1xf32, #tpu.memory_space<smem>>
    %37 = vector.broadcast %36 : f32 to vector<32x1xf32>
    %38 = arith.addf %35, %37 : vector<32x1xf32>
    %c0_28 = arith.constant 0 : index
    %c0_29 = arith.constant 0 : index
    %39 = vector.load %arg12[%c0_28, %c0_29] : memref<32x1xf32, #tpu.memory_space<vmem>>, vector<32x1xf32>
    tpu.vector_store %arg12[%c0_28, %c0_29], %38 {strides = array<i32>} : memref<32x1xf32, #tpu.memory_space<vmem>>, vector<32x1xf32>,
    return
  }
  func.func @transform_0(%arg0: i32) -> (i32, i32) {
    %c0_i32 = arith.constant 0 : i32
    %c0_i32_0 = arith.constant 0 : i32
    return %arg0, %c0_i32 : i32, i32
  }
  func.func @transform_1(%arg0: i32) -> (i32, i32) {
    %c0_i32 = arith.constant 0 : i32
    %c0_i32_0 = arith.constant 0 : i32
    return %arg0, %c0_i32 : i32, i32
  }
  func.func @transform_2(%arg0: i32) -> (i32, i32) {
    %c0_i32 = arith.constant 0 : i32
    %c0_i32_0 = arith.constant 0 : i32
    %c0_i32_1 = arith.constant 0 : i32
    return %c0_i32, %c0_i32_0 : i32, i32
  }
  func.func @transform_3(%arg0: i32) -> (i32, i32) {
    %c0_i32 = arith.constant 0 : i32
    %c0_i32_0 = arith.constant 0 : i32
    %c0_i32_1 = arith.constant 0 : i32
    return %c0_i32, %c0_i32_0 : i32, i32
  }
  func.func @transform_4(%arg0: i32) -> (i32, i32) {
    %c0_i32 = arith.constant 0 : i32
    %c0_i32_0 = arith.constant 0 : i32
    %c0_i32_1 = arith.constant 0 : i32
    return %c0_i32, %c0_i32_0 : i32, i32
  }
  func.func @transform_5(%arg0: i32) -> (i32, i32) {
    %c0_i32 = arith.constant 0 : i32
    %c0_i32_0 = arith.constant 0 : i32
    %c0_i32_1 = arith.constant 0 : i32
    return %c0_i32, %c0_i32_0 : i32, i32
  }
  func.func @transform_6(%arg0: i32) -> (i32, i32) {
    %c0_i32 = arith.constant 0 : i32
    %c0_i32_0 = arith.constant 0 : i32
    %c0_i32_1 = arith.constant 0 : i32
    return %c0_i32, %c0_i32_0 : i32, i32
  }
  func.func @transform_7(%arg0: i32) -> (i32, i32) {
    %c0_i32 = arith.constant 0 : i32
    %c0_i32_0 = arith.constant 0 : i32
    %c0_i32_1 = arith.constant 0 : i32
    return %c0_i32, %c0_i32_0 : i32, i32
  }
  func.func @transform_8(%arg0: i32) -> (i32, i32) {
    %c0_i32 = arith.constant 0 : i32
    %c0_i32_0 = arith.constant 0 : i32
    %c0_i32_1 = arith.constant 0 : i32
    return %c0_i32, %c0_i32_0 : i32, i32
  }
  func.func @transform_9(%arg0: i32) -> (i32, i32) {
    %c0_i32 = arith.constant 0 : i32
    %c0_i32_0 = arith.constant 0 : i32
    %c0_i32_1 = arith.constant 0 : i32
    return %c0_i32, %c0_i32_0 : i32, i32
  }
  func.func @transform_10(%arg0: i32) -> (i32, i32) {
    %c0_i32 = arith.constant 0 : i32
    %c0_i32_0 = arith.constant 0 : i32
    %c0_i32_1 = arith.constant 0 : i32
    return %c0_i32, %c0_i32_0 : i32, i32
  }
  func.func @transform_11(%arg0: i32) -> (i32, i32) {
    %c0_i32 = arith.constant 0 : i32
    %c0_i32_0 = arith.constant 0 : i32
    return %arg0, %c0_i32 : i32, i32
  }
}

</mosaic_0001>

<bundles_post_ra>
// kernel: tpu_custom_call.1
= control target key start
LH: loop header
LB: loop body
LE: loop exit
PB: predicated region body
PF: predicated region fallthrough
CT: control target
= control target key end

     0   :  { %s1678_s0 = inlined_call_operand.vmem [shape: f32[64,32], index: 0, kind: input, shape index: {}]   ;;  %s1679_s1 = inlined_call_operand.vmem [shape: f32[64,8], index: 1, kind: input, shape index: {}]   ;;  %s1680_s2 = inlined_call_operand.vmem [shape: bf16[32,256], index: 2, kind: input, shape index: {}]   ;;  %s1681_s3 = inlined_call_operand.vmem [shape: f32[1,256], index: 3, kind: input, shape index: {}]   ;;  %s1682_s4 = inlined_call_operand.hbm [shape: bf16[256,256], index: 4, kind: input, shape index: {}]   ;;  %s1683_s5 = inlined_call_operand.vmem [shape: bf16[8,256], index: 5, kind: input, shape index: {}]   ;;  %s1684_s6 = inlined_call_operand.vmem [shape: f32[1,256], index: 6, kind: input, shape index: {}]   ;;  %s1685_s7 = inlined_call_operand.vmem [shape: bf16[256,128], index: 7, kind: input, shape index: {}]   ;;  %s1686_s8 = inlined_call_operand.vmem [shape: f32[1,128], index: 8, kind: input, shape index: {}]   ;;  %s1687_s9 = inlined_call_operand.vmem [shape: f32[1,128], index: 9, kind: input, shape index: {}]   ;;  %s1688_s10 = inlined_call_operand.<no memory space> [shape: f32[1,1], index: 10, kind: input, shape index: {}]   ;;  %s1689_s11 = inlined_call_operand.vmem [shape: f32[64,1], index: 11, kind: output, shape index: {}]  }
   0x1   :  { %16 = sst [smem:[#allocation2]] %s1688_s10 }
   0x2   :  { %17 = vsyncpa [#allocation4], 0  ;;  %s1518_s19 = smov 0  }
   0x3 LB: > { %s1205_s20 = sadd.s32 4294967295, %s1449_s19   ;;  %p1207_p0 = scmp.ge.s32.totalorder %s1449_s19, 1  ;;  %s1449_s19 = sphi %s1518_s19, %s23_s19  }
   0x4   : > { %p295_p1 = scmp.lt.s32.totalorder %s1449_s19, 3  ;;  %s1451_s21 = smov [#allocation3]  }
   0x5   : > { %s313_s22 = sshll.u32 %s1451_s21, 4  ;;  %p1532_p3 = scmp.eq.s32.totalorder %s1205_s20, 0  ;;  %s314_s22 = int_to_ptr.vmem [resolvable:$true] %s313_s22 }
   0x6   : > { %p1526_p2 = pnand %p1207_p0, %p295_p1  ;;  %s1411_s27 = scalar_lea.hbm %s1682_s4, 4096 }
   0x7   : > { %s1694_s10 = scalar_select %p1532_p3, 1, 0 }
   0x8   : > { %s1693_s23 = scalar_select %p1526_p2, 1, 0 }
   0x9   : > { %p1321_p4 = pneg %p1526_p2  ;;  %p1412_p6 = scmp.ne.s32.totalorder %s1682_s4, %s1411_s27 }
   0xa   : > { %p1418_p10 = scmp.lt.u32.totalorder %s1411_s27, %s1682_s4 }
   0xb   : > { %p1540_p5 = pnand %p1532_p3, %p1321_p4 }
   0xd   : > { %p1413_p7 = pneg %p1540_p5 }
   0xf   : > { %p1414_p8 = pnand %p1413_p7, %p1412_p6 }
  0x11   : > { %p1415_p9 = pneg %p1414_p8 }
  0x13   : > { %p1420_p11 = pnand %p1418_p10, %p1415_p9 }
  0x15   : > { %1423 = shalt.err (!%p1420_p11)
}
  0x16   : > { %s1424_s13 = scalar_lea.vmem %s314_s22, 4096  ;;  %p1432_p1 = scmp.lt.s32.totalorder %s314_s22, %s314_s22 }
  0x17   : > { %p1425_p12 = scmp.ne.s32.totalorder %s314_s22, %s1424_s13  ;;  %p1433_p4 = scmp.lt.s32.totalorder %s1424_s13, %s1424_s13 }
  0x19   : > { %p1427_p13 = pnand %p1425_p12, %p1413_p7  ;;  %p1434_p3 = por %p1433_p4, %p1432_p1 }
  0x1b   : > { %p1428_p0 = pneg %p1427_p13 }
  0x1d   : > { %p1435_p2 = pnand %p1434_p3, %p1428_p0 }
  0x1f   : > { %1438 = shalt.err (!%p1435_p2)
}
  0x20   : > { %s1452_s14 = smov 128   ;;  %s1453_s15 = smov 8  }
  0x21   : > { %1324 = dma.hbm_to_vmem [thread:$0]  (!%p1540_p5), %s1682_s4, 4096, %s314_s22, [#allocation4], %s1452_s14, %s1452_s14, %s1453_s15  }
  0x22   : > { %p1696_p6 = scmp.ne.s32.totalorder %s1693_s23, 0 }
  0x23   : > { %p1697_p8 = scmp.ne.s32.totalorder (!%p1696_p6), %s1694_s10, 0 }
  0x24   : > { %365 = sbr.rel (%p1696_p6) target bundleno = 879 (0x36f), region = 64 }
  0x2b   : > { %1444 = dma.done.wait (%p1697_p8), [#allocation4], 4096  }
  0x2c   : > { %1446 = vsyncadd (%p1697_p8), [#allocation4], 4294963200  ;;  %s1212_s18 = sshll.u32 %s1205_s20, 2  ;;  %v1454_v0 = vmov 0   ;;  %v1339_v1 = vld [vmem:[%s1680_s2 + $0x4] ss:$8 sps:$4 sm:$0xff]   ;;  %v447_v63 = vlaneseq }
  0x2d   : > { %516 = vmatprep.mubr.bf16.mxu0 %v1454_v0  ;;  %p411_p2 = scmp.lt.s32.totalorder %s1212_s18, 7  ;;  %v1341_v2 = vld [vmem:[%s1680_s2] ss:$8 sps:$4 sm:$0xff]   ;;  %484 = vmatprep.subr.bf16.mxu0 %v1339_v1  ;;  %v1342_v3 = vld [vmem:[%s1680_s2 + $0x14] ss:$8 sps:$4 sm:$0xff]   ;;  %vm477_vm0 = vcmask 261120  }
  0x2e   : > { %485 = vmatpush1.bf16.msra.mxu0 %v1341_v2  ;;  %v1344_v4 = vld [vmem:[%s1680_s2 + $0x10] ss:$8 sps:$4 sm:$0xff]   ;;  %v1345_v7 = vld [vmem:[#allocation3 + $0x4] ss:$8 sps:$4 sm:$0xff]   ;;  %v1347_v8 = vld [vmem:[#allocation3] ss:$8 sps:$4 sm:$0xff]  }
  0x2f   : > { %s1699_s18 = smov (!%p411_p2, %s1212_s18), 7  ;;  %486 = vmatprep.subr.bf16.mxu0 %v1342_v3  ;;  %822 = vmatprep.subr.bf16.mxu1 %v1345_v7  ;;  %v1348_v10 = vld [vmem:[#allocation3 + $0x14] ss:$8 sps:$4 sm:$0xff]   ;;  %v1350_v11 = vld [vmem:[#allocation3 + $0x10] ss:$8 sps:$4 sm:$0xff]   ;;  %v589_v22 = vld [vmem:[%s1683_s5] sm:$0xff] }
  0x30   : > { %s1569_s21 = sshll.u32 %s1699_s18, 3  ;;  %823 = vmatpush1.bf16.msra.mxu1 %v1347_v8  ;;  %v1351_v12 = vld [vmem:[#allocation3 + $0x24] ss:$8 sps:$4 sm:$0xff]   ;;  %v1353_v15 = vld [vmem:[#allocation3 + $0x20] ss:$8 sps:$4 sm:$0xff]   ;;  %vm602_vm1 = vcmask 1043456   ;;  %v1225_v24 = vcombine.high %v589_v22, %v589_v22  ;;  %v1224_v25 = vcombine.low %v589_v22, %v589_v22 }
  0x31   : > { %s414_s10 = scalar_lea.vmem %s1678_s0, %s1569_s21  ;;  %824 = vmatprep.subr.bf16.mxu1 %v1348_v10  ;;  %v1354_v16 = vld [vmem:[#allocation3 + $0x34] ss:$8 sps:$4 sm:$0xff]   ;;  %v1356_v18 = vld [vmem:[#allocation3 + $0x30] ss:$8 sps:$4 sm:$0xff]   ;;  %v1357_v19 = vld [vmem:[#allocation3 + $0x44] ss:$8 sps:$4 sm:$0xff]   ;;  %s420_s16 = scalar_lea.vmem %s1679_s1, %s1569_s21 }
  0x32   : > { %v429_v5 = vld [vmem:[%s414_s10] sm:$0xff]  ;;  %v430_v6 = vld [vmem:[%s414_s10 + $0x8] sm:$0xff]  ;;  %487 = vmatpush1.bf16.msra.mxu0 %v1344_v4  ;;  %v431_v13 = vld [vmem:[%s414_s10 + $0x10] sm:$0xff]  ;;  %v604_v27 = vsel %vm602_vm1, %v1224_v25, 0  ;;  %vm595_vm2 = vcmask 64512   ;;  %s1114_s23 = sld [smem:[#allocation2]]  ;;  %s426_s26 = scalar_lea.vmem %s1689_s11, %s1569_s21 }
  0x33   : > { %v433_v9 = vpack.c.bf16 %v430_v6, %v429_v5  ;;  %v432_v14 = vld [vmem:[%s414_s10 + $0x18] sm:$0xff]  ;;  %v1359_v20 = vld [vmem:[#allocation3 + $0x40] ss:$8 sps:$4 sm:$0xff]   ;;  %v1363_v26 = vld [vmem:[#allocation3 + $0x64] ss:$8 sps:$4 sm:$0xff]   ;;  %1226 = vmatprep.subr.msk.bf16.mxu0 %vm602_vm1, %v1225_v24  ;;  %vm1120_vm3 = vcmask 7168  }
  0x34   : > { %825 = vmatpush1.bf16.msra.mxu1 %v1350_v11  ;;  %v434_v17 = vpack.c.bf16 %v432_v14, %v431_v13  ;;  %v1360_v21 = vld [vmem:[#allocation3 + $0x54] ss:$8 sps:$4 sm:$0xff]   ;;  %v1362_v23 = vld [vmem:[#allocation3 + $0x50] ss:$8 sps:$4 sm:$0xff]   ;;  %v1365_v28 = vld [vmem:[#allocation3 + $0x60] ss:$8 sps:$4 sm:$0xff]  }
  0x35   : > { %1222 = vmatmul.mubr.msk.bf16.vlgmr.msra.gmra.mrb[0].mxu0 %vm477_vm0, %v433_v9  ;;  %826 = vmatprep.subr.bf16.mxu1 %v1351_v12  ;;  %v1366_v29 = vld [vmem:[#allocation3 + $0x74] ss:$8 sps:$4 sm:$0xff]   ;;  %v1368_v30 = vld [vmem:[#allocation3 + $0x70] ss:$8 sps:$4 sm:$0xff]   ;;  %v1369_v31 = vld [vmem:[#allocation3 + $0x84] ss:$8 sps:$4 sm:$0xff]  }
  0x36   : > { %526 = vmatprep.mubr.bf16.mxu0 %v1454_v0  ;;  %610 = vmatpush1.bf16.msra.mxu0 %v604_v27  ;;  %v1371_v32 = vld [vmem:[#allocation3 + $0x80] ss:$8 sps:$4 sm:$0xff]   ;;  %v1372_v33 = vld [vmem:[#allocation3 + $0x94] ss:$8 sps:$4 sm:$0xff]   ;;  %v1374_v34 = vld [vmem:[#allocation3 + $0x90] ss:$8 sps:$4 sm:$0xff]  }
  0x37   : > { %v1375_v35 = vld [vmem:[#allocation3 + $0xa4] ss:$8 sps:$4 sm:$0xff]   ;;  %v1377_v36 = vld [vmem:[#allocation3 + $0xa0] ss:$8 sps:$4 sm:$0xff]   ;;  %v1378_v37 = vld [vmem:[#allocation3 + $0xb4] ss:$8 sps:$4 sm:$0xff]  }
  0x38   : > { %827 = vmatpush1.bf16.msra.mxu1 %v1353_v15  ;;  %v1380_v38 = vld [vmem:[#allocation3 + $0xb0] ss:$8 sps:$4 sm:$0xff]   ;;  %v1383_v39 = vld [vmem:[#allocation3 + $0xc4] ss:$8 sps:$4 sm:$0xff]   ;;  %v1385_v40 = vld [vmem:[#allocation3 + $0xc0] ss:$8 sps:$4 sm:$0xff]  }
  0x39   : > { %828 = vmatprep.subr.bf16.mxu1 %v1354_v16  ;;  %v1386_v41 = vld [vmem:[#allocation3 + $0xd4] ss:$8 sps:$4 sm:$0xff]   ;;  %v1388_v42 = vld [vmem:[#allocation3 + $0xd0] ss:$8 sps:$4 sm:$0xff]   ;;  %v1389_v43 = vld [vmem:[#allocation3 + $0xe4] ss:$8 sps:$4 sm:$0xff]  }
  0x3a   : > { %v1391_v44 = vld [vmem:[#allocation3 + $0xe0] ss:$8 sps:$4 sm:$0xff]   ;;  %v1392_v45 = vld [vmem:[#allocation3 + $0xf4] ss:$8 sps:$4 sm:$0xff]   ;;  %v1394_v49 = vld [vmem:[#allocation3 + $0xf0] ss:$8 sps:$4 sm:$0xff]  }
  0x3b   : > { %v435_v46 = vld [vmem:[%s420_s16] sm:$0xff]  ;;  %v436_v47 = vld [vmem:[%s420_s16 + $0x8] sm:$0xff]  ;;  %v437_v50 = vld [vmem:[%s420_s16 + $0x10] sm:$0xff] }
  0x3c   : > { %829 = vmatpush1.bf16.msra.mxu1 %v1356_v18  ;;  %v439_v48 = vpack.c.bf16 %v436_v47, %v435_v46  ;;  %v438_v51 = vld [vmem:[%s420_s16 + $0x18] sm:$0xff]  ;;  %v1395_v53 = vld [vmem:[%s1685_s7 + $0x40] sm:$0xff]   ;;  %v1397_v55 = vld [vmem:[%s1685_s7 + $0x48] sm:$0xff]  }
  0x3d   : > { %1223 = vmatmul.mubr.msk.bf16.gmra.mrb[4].mxu0 %vm477_vm0, %v434_v17  ;;  %830 = vmatprep.subr.bf16.mxu1 %v1357_v19  ;;  %v440_v52 = vpack.c.bf16 %v438_v51, %v437_v50  ;;  %v1396_v54 = vld [vmem:[%s1685_s7] sm:$0xff]   ;;  %v1398_v56 = vld [vmem:[%s1685_s7 + $0x8] sm:$0xff]   ;;  %v1399_v57 = vld [vmem:[%s1685_s7 + $0x50] sm:$0xff]  }
  0x3e   : > { %641 = vmatprep.mubr.bf16.mxu0 %v1454_v0  ;;  %1281 = vmatprep.subr.bf16.mxu0 %v1395_v53  ;;  %v1400_v58 = vld [vmem:[%s1685_s7 + $0x10] sm:$0xff]   ;;  %v1401_v59 = vld [vmem:[%s1685_s7 + $0x58] sm:$0xff]   ;;  %v1403_v61 = vld [vmem:[%s1685_s7 + $0x60] sm:$0xff]  }
  0x3f   : > { %v1402_v60 = vld [vmem:[%s1685_s7 + $0x18] sm:$0xff]   ;;  %v1404_v62 = vld [vmem:[%s1685_s7 + $0x20] sm:$0xff]   ;;  %v1406_v47 = vld [vmem:[%s1685_s7 + $0x28] sm:$0xff]  }
  0x40   : > { %831 = vmatpush1.bf16.msra.mxu1 %v1359_v20  ;;  %v445_v2 = vld [vmem:[%s1681_s3] sm:$0x3]  ;;  %v1409_v53 = vld [vmem:[%s1685_s7 + $0x78] sm:$0xff]  }
  0x41   : > { %832 = vmatprep.subr.bf16.mxu1 %v1360_v21 }
  0x44   : > { %833 = vmatpush1.bf16.msra.mxu1 %v1362_v23 }
  0x45   : > { %834 = vmatprep.subr.bf16.mxu1 %v1363_v26  ;;  %1227 = vmatmul.mubr.msk.bf16.vlgmr.msra.gmra.mrb[8].mxu0 %vm595_vm2, %v439_v48  ;;  %v1407_v48 = vld [vmem:[%s1685_s7 + $0x70] sm:$0xff]  }
  0x46   : > { %651 = vmatprep.mubr.bf16.mxu0 %v1454_v0  ;;  %1282 = vmatpush3.bf16.msra.mxu0 %v1396_v54  ;;  %v1629_v0 = vshrl.u32 %v447_v63, 7 }
  0x47   : > { %1283 = vmatprep.subr.bf16.mxu0 %v1397_v55  ;;  %v1410_v55 = vld [vmem:[%s1685_s7 + $0x38] sm:$0xff]  }
  0x48   : > { %835 = vmatpush1.bf16.msra.mxu1 %v1365_v28  ;;  %v449_v1 = vsub.s32 0, %v1629_v0  ;;  %v453_v3 = vsub.s32 1, %v1629_v0 }
  0x49   : > { %836 = vmatprep.subr.bf16.mxu1 %v1366_v29 }
  0x4a   : > { %1284 = vmatpush3.bf16.msra.mxu0 %v1398_v56  ;;  %v450_v4 = vrot.slane %v445_v2, %v449_v1  ;;  %v454_v5 = vrot.slane %v445_v2, %v453_v3  ;;  %v875_v56 = vld [vmem:[%s1684_s6] sm:$0x3] }
  0x4b   : > { %1285 = vmatprep.subr.bf16.mxu0 %v1399_v57  ;;  %v880_v57 = vrot.slane %v875_v56, %v449_v1 }
  0x4c   : > { %837 = vmatpush1.bf16.msra.mxu1 %v1368_v30 }
  0x4d   : > { %838 = vmatprep.subr.bf16.mxu1 %v1369_v31  ;;  %1228 = vmatmul.mubr.msk.bf16.gmra.mrb[12].mxu0 %vm595_vm2, %v440_v52 }
  0x4e   : > { %1286 = vmatpush3.bf16.msra.mxu0 %v1400_v58 }
  0x4f   : > { %1287 = vmatprep.subr.bf16.mxu0 %v1401_v59  ;;  %v884_v59 = vrot.slane %v875_v56, %v453_v3 }
  0x50   : > { %839 = vmatpush1.bf16.msra.mxu1 %v1371_v32 }
  0x51   : > { %840 = vmatprep.subr.bf16.mxu1 %v1372_v33 }
  0x52   : > { %1288 = vmatpush3.bf16.msra.mxu0 %v1402_v60 }
  0x53   : > { %1289 = vmatprep.subr.bf16.mxu0 %v1403_v61 }
  0x54   : > { %841 = vmatpush1.bf16.msra.mxu1 %v1374_v34 }
  0x55   : > { %842 = vmatprep.subr.bf16.mxu1 %v1375_v35 }
  0x56   : > { %1290 = vmatpush3.bf16.msra.mxu0 %v1404_v62 }
  0x58   : > { %843 = vmatpush1.bf16.msra.mxu1 %v1377_v36 }
  0x59   : > { %844 = vmatprep.subr.bf16.mxu1 %v1378_v37 }
  0x5c   : > { %845 = vmatpush1.bf16.msra.mxu1 %v1380_v38 }
  0x5d   : > { %846 = vmatprep.subr.bf16.mxu1 %v1383_v39 }
  0x60   : > { %847 = vmatpush1.bf16.msra.mxu1 %v1385_v40 }
  0x61   : > { %848 = vmatprep.subr.bf16.mxu1 %v1386_v41 }
  0x64   : > { %849 = vmatpush1.bf16.msra.mxu1 %v1388_v42 }
  0x65   : > { %850 = vmatprep.subr.bf16.mxu1 %v1389_v43 }
  0x68   : > { %851 = vmatpush1.bf16.msra.mxu1 %v1391_v44 }
  0x69   : > { %852 = vmatprep.subr.bf16.mxu1 %v1392_v45  ;;  %v1405_v45 = vld [vmem:[%s1685_s7 + $0x68] sm:$0xff]  }
  0x6a   : > { %1291 = vmatprep.subr.bf16.mxu0 %v1405_v45 }
  0x6b   : > { %1292 = vmatpush3.bf16.msra.mxu0 %v1406_v47 }
  0x6c   : > { %853 = vmatpush1.bf16.msra.mxu1 %v1394_v49  ;;  %v1408_v49 = vld [vmem:[%s1685_s7 + $0x30] sm:$0xff]   ;;  %1293 = vmatprep.subr.bf16.mxu0 %v1407_v48 }
  0x6f   : > { %1294 = vmatpush3.bf16.msra.mxu0 %v1408_v49 }
  0x70   : > { %1295 = vmatprep.subr.bf16.mxu0 %v1409_v53 }
  0x73   : > { %1296 = vmatpush3.bf16.msra.mxu0 %v1410_v55 }
 0x108   : > { %v518_v6 = vpop.f32.mrb[0].mxu0 }
 0x109   : > { %v519_v7 = vadd.f32 %v518_v6, %v450_v4  ;;  %v520_v8 = vpop.f32.mrb[1].mxu0 }
 0x10a   : > { %v521_v9 = vadd.f32 %v520_v8, %v454_v5  ;;  %v522_v10 = vpop.f32.mrb[2].mxu0 }
 0x10b   : > { %v537_v11 = vmul.f32 0.01, %v519_v7  ;;  %v523_v12 = vadd.f32 %v522_v10, %v450_v4  ;;  %v524_v13 = vpop.f32.mrb[3].mxu0 }
 0x10c   : > { %v538_v14 = vmul.f32 0.01, %v521_v9  ;;  %v525_v15 = vadd.f32 %v524_v13, %v454_v5 }
 0x10d   : > { %v539_v16 = vmul.f32 0.01, %v523_v12  ;;  %v545_v18 = vmax.f32 %v519_v7, %v537_v11 }
 0x10e   : > { %v540_v17 = vmul.f32 0.01, %v525_v15  ;;  %v546_v21 = vmax.f32 %v521_v9, %v538_v14 }
 0x10f   : > { %v547_v19 = vmax.f32 %v523_v12, %v539_v16 }
 0x110   : > { %v528_v20 = vpop.f32.mrb[4].mxu0  ;;  %v548_v22 = vmax.f32 %v525_v15, %v540_v17 }
 0x111   : > { %v529_v23 = vadd.f32 %v528_v20, %v450_v4  ;;  %v530_v24 = vpop.f32.mrb[5].mxu0  ;;  %v553_v25 = vpack.c.bf16 %v547_v19, %v545_v18 }
 0x112   : > { %v531_v26 = vadd.f32 %v530_v24, %v454_v5  ;;  %v532_v27 = vpop.f32.mrb[6].mxu0  ;;  %v554_v28 = vpack.c.bf16 %v548_v22, %v546_v21 }
 0x113   : > { %v541_v29 = vmul.f32 0.01, %v529_v23  ;;  %v533_v30 = vadd.f32 %v532_v27, %v450_v4  ;;  %v534_v31 = vpop.f32.mrb[7].mxu0 }
 0x114   : > { %v542_v32 = vmul.f32 0.01, %v531_v26  ;;  %v535_v33 = vadd.f32 %v534_v31, %v454_v5  ;;  %854 = vmatprep.mubr.bf16.mxu1 %v554_v28 }
 0x115   : > { %v543_v34 = vmul.f32 0.01, %v533_v30  ;;  %855 = vmatmul.mubr.bf16.vlgmr.msra.gmra.mrb[0].mxu1 %v553_v25  ;;  %v549_v36 = vmax.f32 %v529_v23, %v541_v29 }
 0x116   : > { %v544_v35 = vmul.f32 0.01, %v535_v33  ;;  %v550_v38 = vmax.f32 %v531_v26, %v542_v32 }
 0x117   : > { %v551_v37 = vmax.f32 %v533_v30, %v543_v34 }
 0x118   : > { %v552_v39 = vmax.f32 %v535_v33, %v544_v35  ;;  %v643_v42 = vpop.f32.mrb[8].mxu0  ;;  %v1261_v33 = vld [vmem:[%s1686_s8] ss:$0 sm:$0xff] }
 0x119   : > { %v555_v40 = vpack.c.bf16 %v551_v37, %v549_v36  ;;  %v645_v43 = vpop.f32.mrb[9].mxu0 }
 0x11a   : > { %v556_v41 = vpack.c.bf16 %v552_v39, %v550_v38  ;;  %v647_v44 = vpop.f32.mrb[10].mxu0  ;;  %v1278_v39 = vld [vmem:[%s1687_s9] ss:$0 sm:$0xff] }
 0x11b   : > { %v649_v46 = vpop.f32.mrb[11].mxu0 }
 0x11c   : > { %864 = vmatprep.mubr.bf16.mxu1 %v556_v41 }
 0x11d   : > { %865 = vmatmul.mubr.bf16.gmra.mrb[4].mxu1 %v555_v40 }
 0x120   : > { %v653_v50 = vpop.f32.mrb[12].mxu0 }
 0x121   : > { %v655_v51 = vpop.f32.mrb[13].mxu0 }
 0x122   : > { %v657_v52 = vpop.f32.mrb[14].mxu0 }
 0x123   : > { %v659_v54 = vpop.f32.mrb[15].mxu0 }
 0x1e8   : > { %v856_v58 = vpop.f32.mrb[0].mxu1 }
 0x1e9   : > { %v857_v60 = vadd.f32 %v856_v58, %v643_v42  ;;  %v858_v61 = vpop.f32.mrb[1].mxu1 }
 0x1ea   : > { %v859_v62 = vadd.f32 %v858_v61, %v645_v43  ;;  %v860_v63 = vpop.f32.mrb[2].mxu1 }
 0x1eb   : > { %v887_v2 = vadd.f32 %v880_v57, %v857_v60  ;;  %v861_v4 = vadd.f32 %v860_v63, %v647_v44  ;;  %v862_v5 = vpop.f32.mrb[3].mxu1 }
 0x1ec   : > { %v888_v6 = vadd.f32 %v884_v59, %v859_v62  ;;  %v863_v7 = vadd.f32 %v862_v5, %v649_v46 }
 0x1ed   : > { %v889_v8 = vadd.f32 %v880_v57, %v861_v4  ;;  %v895_v10 = vmax.f32 %v887_v2, 0.0 }
 0x1ee   : > { %v890_v9 = vadd.f32 %v884_v59, %v863_v7  ;;  %v896_v12 = vmax.f32 %v888_v6, 0.0 }
 0x1ef   : > { %v897_v11 = vmax.f32 %v889_v8, 0.0 }
 0x1f0   : > { %v898_v13 = vmax.f32 %v890_v9, 0.0  ;;  %v866_v1 = vpop.f32.mrb[4].mxu1 }
 0x1f1   : > { %v903_v14 = vpack.c.bf16 %v897_v11, %v895_v10  ;;  %v867_v15 = vadd.f32 %v866_v1, %v653_v50  ;;  %v868_v0 = vpop.f32.mrb[5].mxu1 }
 0x1f2   : > { %v869_v3 = vadd.f32 %v868_v0, %v655_v51  ;;  %v870_v16 = vpop.f32.mrb[6].mxu1  ;;  %v904_v17 = vpack.c.bf16 %v898_v13, %v896_v12 }
 0x1f3   : > { %v891_v18 = vadd.f32 %v880_v57, %v867_v15  ;;  %v871_v19 = vadd.f32 %v870_v16, %v657_v52  ;;  %v872_v20 = vpop.f32.mrb[7].mxu1 }
 0x1f4   : > { %v892_v21 = vadd.f32 %v884_v59, %v869_v3  ;;  %v873_v22 = vadd.f32 %v872_v20, %v659_v54  ;;  %1074 = vmatprep.mubr.bf16.mxu0 %v904_v17 }
 0x1f5   : > { %v893_v23 = vadd.f32 %v880_v57, %v871_v19  ;;  %1075 = vmatmul.mubr.bf16.vlgmr.msra.gmra.mrb[16].mxu0 %v903_v14  ;;  %v899_v25 = vmax.f32 %v891_v18, 0.0  ;;  %v1115_v57 = vstv %s1114_s23 }
 0x1f6   : > { %v894_v24 = vadd.f32 %v884_v59, %v873_v22  ;;  %v900_v27 = vmax.f32 %v892_v21, 0.0 }
 0x1f7   : > { %v901_v26 = vmax.f32 %v893_v23, 0.0 }
 0x1f8   : > { %v902_v28 = vmax.f32 %v894_v24, 0.0 }
 0x1f9   : > { %v905_v29 = vpack.c.bf16 %v901_v26, %v899_v25 }
 0x1fa   : > { %v906_v30 = vpack.c.bf16 %v902_v28, %v900_v27 }
 0x1fc   : > { %1082 = vmatprep.mubr.bf16.mxu0 %v906_v30 }
 0x1fd   : > { %1083 = vmatmul.mubr.bf16.gmra.mrb[20].mxu0 %v905_v29 }
 0x2c8   : > { %v1297_v31 = vpop.f32.mrb[16].mxu0 }
 0x2c9   : > { %v1298_v32 = vpop.f32.mrb[17].mxu0 }
 0x2ca   : > { %v1299_v34 = vadd.f32 %v1298_v32, %v1297_v31  ;;  %v1300_v35 = vpop.f32.mrb[18].mxu0 }
 0x2cb   : > { %v1301_v36 = vpop.f32.mrb[19].mxu0 }
 0x2cc   : > { %v1302_v37 = vadd.f32 %v1301_v36, %v1300_v35  ;;  %v1077_v38 = vadd.f32 %v1299_v34, %v1261_v33 }
 0x2ce   : > { %v1080_v40 = vadd.f32 %v1302_v37, %v1261_v33  ;;  %v1091_v41 = vmax.f32 %v1077_v38, 0.0 }
 0x2d0   : > { %v1092_v42 = vmax.f32 %v1080_v40, 0.0  ;;  %v1303_v43 = vpop.f32.mrb[20].mxu0  ;;  %v1102_v44 = vmul.f32 %v1278_v39, %v1091_v41 }
 0x2d1   : > { %v1304_v45 = vpop.f32.mrb[21].mxu0 }
 0x2d2   : > { %v1305_v46 = vadd.f32 %v1304_v45, %v1303_v43  ;;  %v1306_v47 = vpop.f32.mrb[22].mxu0  ;;  %1106 = vadd.xlane.f32.xlu0 %v1102_v44  ;;  %v1103_v50 = vmul.f32 %v1278_v39, %v1092_v42 }
 0x2d3   : > { %v1307_v48 = vpop.f32.mrb[23].mxu0 }
 0x2d4   : > { %v1308_v49 = vadd.f32 %v1307_v48, %v1306_v47  ;;  %v1085_v51 = vadd.f32 %v1305_v46, %v1261_v33 }
 0x2d6   : > { %v1088_v52 = vadd.f32 %v1308_v49, %v1261_v33  ;;  %1108 = vadd.xlane.f32.xlu0 %v1103_v50  ;;  %v1093_v53 = vmax.f32 %v1085_v51, 0.0 }
 0x2d8   : > { %v1094_v54 = vmax.f32 %v1088_v52, 0.0  ;;  %v1104_v55 = vmul.f32 %v1278_v39, %v1093_v53 }
 0x2da   : > { %1110 = vadd.xlane.f32.xlu1 %v1104_v55  ;;  %v1105_v56 = vmul.f32 %v1278_v39, %v1094_v54 }
 0x2de   : > { %1112 = vadd.xlane.f32.xlu1 %v1105_v56 }
 0x35f   : > { %v1107_v58 = vpop.xlane.xlu0 %1106 }
 0x360   : > { %v1116_v59 = vadd.f32 %v1115_v57, %v1107_v58 }
 0x362   : > { %1121 = vst.msk [vmem:[%s426_s26] sm:$0xff] %vm1120_vm3, %v1116_v59 }
 0x363   : > { %v1109_v60 = vpop.xlane.xlu0 %1108 }
 0x364   : > { %v1117_v61 = vadd.f32 %v1115_v57, %v1109_v60 }
 0x366   : > { %1122 = vst.msk [vmem:[%s426_s26 + $0x8] sm:$0xff] %vm1120_vm3, %v1117_v61 }
 0x367   : > { %v1111_v62 = vpop.xlane.xlu1 %1110 }
 0x368   : > { %v1118_v63 = vadd.f32 %v1115_v57, %v1111_v62 }
 0x36a   : > { %1123 = vst.msk [vmem:[%s426_s26 + $0x10] sm:$0xff] %vm1120_vm3, %v1118_v63 }
 0x36b   : > { %v1113_v2 = vpop.xlane.xlu1 %1112 }
 0x36c   : > { %v1119_v4 = vadd.f32 %v1115_v57, %v1113_v2 }
 0x36e   : > { %1124 = vst.msk [vmem:[%s426_s26 + $0x18] sm:$0xff] %vm1120_vm3, %v1119_v4 }
 0x36f PF: > { %s23_s19 = sadd.s32 1, %s1449_s19  }
 0x370   : > { %p20_p3 = scmp.ge.s32.totalorder %s23_s19, 4  }
 0x372   :  { %22 = sbr.rel (!%p20_p3) target bundleno = 3 (0x3), region = 102 }
 0x379   :  { %1147 = vsyncpa [#allocation4], 1 }
 0x37a   :  { %1149 = vsyncpa [#allocation4 + $0x1], 1 }

</bundles_post_ra>
